<compile_context>
chip_gen: v7x
topology: tpu7x:2x2x1
jax: 0.10.0
libtpu: 0.0.40
codegen_flags: <defaults>
</compile_context>

<pallas_src>
import jax
import jax.numpy as jnp
from jax.experimental import pallas as pl
from jax.experimental.pallas import tpu as pltpu

_LANES = 128  # TPU lane width


def _round_up(x, m):
    return (x + m - 1) // m * m


def _sigmoid(x):
    # EUP-friendly, divide-free sigmoid (mathematically exact).
    return 0.5 * (jnp.tanh(0.5 * x) + 1.0)


def mlp_kernel(x_ref,
               w1_ref, b1_ref,
               w2_ref, b2_ref,
               w3_ref, b3_ref,
               w4_ref, b4_ref,
               o_ref):
    # x_ref: (TB, n_feature) f32; w*: bf16 (in, out); b*: f32 (1, out).
    x = x_ref[...].astype(jnp.bfloat16)            # in-kernel cast (free under DMA slack)

    h = jnp.dot(x, w1_ref[...],
                preferred_element_type=jnp.float32) + b1_ref[...]
    h = _sigmoid(h)

    h = jnp.dot(h.astype(jnp.bfloat16), w2_ref[...],
                preferred_element_type=jnp.float32) + b2_ref[...]
    h = _sigmoid(h)

    h = jnp.dot(h.astype(jnp.bfloat16), w3_ref[...],
                preferred_element_type=jnp.float32) + b3_ref[...]
    h = _sigmoid(h)

    out = jnp.dot(h.astype(jnp.bfloat16), w4_ref[...],
                  preferred_element_type=jnp.float32) + b4_ref[...]
    # True-width (TB, n_output) store: tiny masked vst, but ~32x less HBM traffic
    # than a 128-lane padded f32 slab.
    o_ref[...] = out.astype(o_ref.dtype)


def _resident_spec(shape):
    # Same block index every grid step -> operand stays VMEM-resident.
    # `shape` is bound per call (no late-binding closure bug).
    return pl.BlockSpec(shape, lambda i: (0,) * len(shape))


def _choose_tb(B, tb):
    """Batch tile: big (amortize per-step overhead), multiple of 16, and
    >= 2 grid steps for large B so v7x megacore can split the batch."""
    tb = max(16, (tb // 16) * 16)
    if B > 512:
        tb = min(tb, _round_up(-(-B // 2), 16))    # at least 2 grid steps
    return min(tb, _round_up(B, 8))                # don't over-tile tiny batches


def prepare_params(params, *, pad_hidden_to=_LANES):
    """One-time model prep: cast weights to bf16 and zero-pad hidden dims to a
    multiple of 128 so intermediate tiles / inner matmuls are lane-dense.

    Padding is exact: padded hidden pre-activations are 0 -> sigmoid = 0.5, but
    the corresponding *rows* of the next weight matrix are zero, so padded
    columns contribute exactly 0 downstream.
    """
    n_hidden = params["w1"].shape[1]
    Hp = _round_up(n_hidden, pad_hidden_to)
    ph = Hp - n_hidden
    bf = jnp.bfloat16
    return {
        "w1": jnp.pad(params["w1"], ((0, 0), (0, ph))).astype(bf),
        "b1": jnp.pad(params["b1"], ((0, 0), (0, ph))),
        "w2": jnp.pad(params["w2"], ((0, ph), (0, ph))).astype(bf),
        "b2": jnp.pad(params["b2"], ((0, 0), (0, ph))),
        "w3": jnp.pad(params["w3"], ((0, ph), (0, ph))).astype(bf),
        "b3": jnp.pad(params["b3"], ((0, 0), (0, ph))),
        "w4": jnp.pad(params["w4"], ((0, ph), (0, 0))).astype(bf),
        "b4": params["b4"],
    }


def mlp_forward(x, prep, *, tb=2048):
    """x: (B, n_feature) float32; prep: output of prepare_params (bf16 weights,
    f32 biases, hidden dims padded lane-dense)."""
    B, n_feature = x.shape
    n_output = prep["w4"].shape[1]

    TB = _choose_tb(B, tb)
    grid = (pl.cdiv(B, TB),)

    in_specs = [
        pl.BlockSpec((TB, n_feature), lambda i: (i, 0)),   # x: tiled over batch
        _resident_spec(prep["w1"].shape), _resident_spec(prep["b1"].shape),
        _resident_spec(prep["w2"].shape), _resident_spec(prep["b2"].shape),
        _resident_spec(prep["w3"].shape), _resident_spec(prep["b3"].shape),
        _resident_spec(prep["w4"].shape), _resident_spec(prep["b4"].shape),
    ]
    out_specs = pl.BlockSpec((TB, n_output), lambda i: (i, 0))

    return pl.pallas_call(
        mlp_kernel,
        out_shape=jax.ShapeDtypeStruct((B, n_output), jnp.float32),
        grid=grid,
        in_specs=in_specs,
        out_specs=out_specs,
        compiler_params=pltpu.CompilerParams(
            dimension_semantics=("parallel",),   # megacore sharding on v7x
        ),
    )(x,
      prep["w1"], prep["b1"],
      prep["w2"], prep["b2"],
      prep["w3"], prep["b3"],
      prep["w4"], prep["b4"])


def init_params(key, n_feature, n_hidden, n_output):
    """Deterministic init mimicking PyTorch Linear default U(-1/sqrt(in), 1/sqrt(in))."""
    dims = [(n_feature, n_hidden), (n_hidden, n_hidden),
            (n_hidden, n_hidden), (n_hidden, n_output)]
    params = {}
    for i, (fan_in, fan_out) in enumerate(dims, start=1):
        key, kw, kb = jax.random.split(key, 3)
        bound = 1.0 / float(fan_in) ** 0.5
        params[f"w{i}"] = jax.random.uniform(
            kw, (fan_in, fan_out), jnp.float32, minval=-bound, maxval=bound)
        params[f"b{i}"] = jax.random.uniform(
            kb, (1, fan_out), jnp.float32, minval=-bound, maxval=bound)
    return params


def reference_forward_f32(x, params):
    h = jax.nn.sigmoid(x @ params["w1"] + params["b1"])
    h = jax.nn.sigmoid(h @ params["w2"] + params["b2"])
    h = jax.nn.sigmoid(h @ params["w3"] + params["b3"])
    return h @ params["w4"] + params["b4"]


def reference_forward_bf16(x, params):
    bf = jnp.bfloat16
    h = jax.nn.sigmoid(jnp.dot(x.astype(bf), params["w1"].astype(bf),
                               preferred_element_type=jnp.float32) + params["b1"])
    h = jax.nn.sigmoid(jnp.dot(h.astype(bf), params["w2"].astype(bf),
                               preferred_element_type=jnp.float32) + params["b2"])
    h = jax.nn.sigmoid(jnp.dot(h.astype(bf), params["w3"].astype(bf),
                               preferred_element_type=jnp.float32) + params["b3"])
    return jnp.dot(h.astype(bf), params["w4"].astype(bf),
                   preferred_element_type=jnp.float32) + params["b4"]


if __name__ == "__main__":
    n_feature, n_hidden, n_output = 16, 32, 4
    batch = 8

    key = jax.random.PRNGKey(0)
    key, kx = jax.random.split(key)
    x = jax.random.normal(kx, (batch, n_feature), dtype=jnp.float32)
    params = init_params(key, n_feature, n_hidden, n_output)
    prep = prepare_params(params)          # one-time bf16 cast + lane-dense padding

    out = jax.block_until_ready(mlp_forward(x, prep))
    assert out.shape == (batch, n_output)

    ref_bf16 = reference_forward_bf16(x, params)
    ref_f32 = reference_forward_f32(x, params)
    assert jnp.allclose(out, ref_bf16, atol=1e-2, rtol=1e-2), "mismatch vs bf16 reference"
    assert jnp.allclose(out, ref_f32, atol=5e-2, rtol=5e-2), "mismatch vs f32 reference"

    # Larger, non-multiple-of-tile batch exercises edge-block masking and the
    # >=2-grid-step (megacore) split without any wrapper-side padding.
    x2 = jax.random.normal(jax.random.PRNGKey(1), (1000, n_feature), dtype=jnp.float32)
    out2 = jax.block_until_ready(mlp_forward(x2, prep))
    assert out2.shape == (1000, n_output)
    assert jnp.allclose(out2, reference_forward_bf16(x2, params),
                        atol=1e-2, rtol=1e-2), "mismatch vs bf16 reference (tiled)"

    print("KERNEL_OK")
</pallas_src>

<mosaic_0001>
module attributes {stable_mosaic.version = 11 : i64} {
  func.func @mlp_kernel(%arg0: i32, %arg1: memref<8x16xf32, #tpu.memory_space<vmem>>, %arg2: memref<16x128xbf16, #tpu.memory_space<vmem>>, %arg3: memref<1x128xf32, #tpu.memory_space<vmem>>, %arg4: memref<128x128xbf16, #tpu.memory_space<vmem>>, %arg5: memref<1x128xf32, #tpu.memory_space<vmem>>, %arg6: memref<128x128xbf16, #tpu.memory_space<vmem>>, %arg7: memref<1x128xf32, #tpu.memory_space<vmem>>, %arg8: memref<128x4xbf16, #tpu.memory_space<vmem>>, %arg9: memref<1x4xf32, #tpu.memory_space<vmem>>, %arg10: memref<8x4xf32, #tpu.memory_space<vmem>>) attributes {dimension_semantics = [#tpu.dimension_semantics<parallel>], iteration_bounds = array<i64: 1>, scalar_prefetch = 0 : i64, scratch_operands = 0 : i64, tpu.core_type = #tpu.core_type<tc>, window_params = [{transform_indices = @transform_0, window_bounds = array<i64: 8, 16>}, {pipeline_mode = #tpu.pipeline_mode<synchronous>, transform_indices = @transform_1, window_bounds = array<i64: 16, 128>}, {pipeline_mode = #tpu.pipeline_mode<synchronous>, transform_indices = @transform_2, window_bounds = array<i64: 1, 128>}, {pipeline_mode = #tpu.pipeline_mode<synchronous>, transform_indices = @transform_3, window_bounds = array<i64: 128, 128>}, {pipeline_mode = #tpu.pipeline_mode<synchronous>, transform_indices = @transform_4, window_bounds = array<i64: 1, 128>}, {pipeline_mode = #tpu.pipeline_mode<synchronous>, transform_indices = @transform_5, window_bounds = array<i64: 128, 128>}, {pipeline_mode = #tpu.pipeline_mode<synchronous>, transform_indices = @transform_6, window_bounds = array<i64: 1, 128>}, {pipeline_mode = #tpu.pipeline_mode<synchronous>, transform_indices = @transform_7, window_bounds = array<i64: 128, 4>}, {pipeline_mode = #tpu.pipeline_mode<synchronous>, transform_indices = @transform_8, window_bounds = array<i64: 1, 4>}, {transform_indices = @transform_9, window_bounds = array<i64: 8, 4>}]} {
    %c0 = arith.constant 0 : index
    %c0_0 = arith.constant 0 : index
    %0 = vector.load %arg1[%c0, %c0_0] : memref<8x16xf32, #tpu.memory_space<vmem>>, vector<8x16xf32>
    %1 = arith.truncf %0 : vector<8x16xf32> to vector<8x16xbf16>
    %c0_1 = arith.constant 0 : index
    %c0_2 = arith.constant 0 : index
    %2 = vector.load %arg2[%c0_1, %c0_2] : memref<16x128xbf16, #tpu.memory_space<vmem>>, vector<16x128xbf16>
    %cst = arith.constant dense<0.000000e+00> : vector<8x128xf32>
    %3 = tpu.matmul %1, %2, %cst {dimension_numbers = #tpu.dot_dimension_numbers<[1], [0], [0], [1], [0, 0, 1, 1], [], []>} : vector<8x16xbf16>, vector<16x128xbf16>, vector<8x128xf32> -> vector<8x128xf32>
    %c0_3 = arith.constant 0 : index
    %c0_4 = arith.constant 0 : index
    %4 = vector.load %arg3[%c0_3, %c0_4] : memref<1x128xf32, #tpu.memory_space<vmem>>, vector<1x128xf32>
    %5 = vector.broadcast %4 : vector<1x128xf32> to vector<8x128xf32>
    %6 = arith.addf %3, %5 : vector<8x128xf32>
    %cst_5 = arith.constant 5.000000e-01 : f32
    %7 = vector.broadcast %cst_5 : f32 to vector<8x128xf32>
    %8 = arith.mulf %7, %6 : vector<8x128xf32>
    %9 = math.tanh %8 : vector<8x128xf32>
    %cst_6 = arith.constant 1.000000e+00 : f32
    %10 = vector.broadcast %cst_6 : f32 to vector<8x128xf32>
    %11 = arith.addf %9, %10 : vector<8x128xf32>
    %cst_7 = arith.constant 5.000000e-01 : f32
    %12 = vector.broadcast %cst_7 : f32 to vector<8x128xf32>
    %13 = arith.mulf %12, %11 : vector<8x128xf32>
    %14 = arith.truncf %13 : vector<8x128xf32> to vector<8x128xbf16>
    %c0_8 = arith.constant 0 : index
    %c0_9 = arith.constant 0 : index
    %15 = vector.load %arg4[%c0_8, %c0_9] : memref<128x128xbf16, #tpu.memory_space<vmem>>, vector<128x128xbf16>
    %cst_10 = arith.constant dense<0.000000e+00> : vector<8x128xf32>
    %16 = tpu.matmul %14, %15, %cst_10 {dimension_numbers = #tpu.dot_dimension_numbers<[1], [0], [0], [1], [0, 0, 1, 1], [], []>} : vector<8x128xbf16>, vector<128x128xbf16>, vector<8x128xf32> -> vector<8x128xf32>
    %c0_11 = arith.constant 0 : index
    %c0_12 = arith.constant 0 : index
    %17 = vector.load %arg5[%c0_11, %c0_12] : memref<1x128xf32, #tpu.memory_space<vmem>>, vector<1x128xf32>
    %18 = vector.broadcast %17 : vector<1x128xf32> to vector<8x128xf32>
    %19 = arith.addf %16, %18 : vector<8x128xf32>
    %cst_13 = arith.constant 5.000000e-01 : f32
    %20 = vector.broadcast %cst_13 : f32 to vector<8x128xf32>
    %21 = arith.mulf %20, %19 : vector<8x128xf32>
    %22 = math.tanh %21 : vector<8x128xf32>
    %cst_14 = arith.constant 1.000000e+00 : f32
    %23 = vector.broadcast %cst_14 : f32 to vector<8x128xf32>
    %24 = arith.addf %22, %23 : vector<8x128xf32>
    %cst_15 = arith.constant 5.000000e-01 : f32
    %25 = vector.broadcast %cst_15 : f32 to vector<8x128xf32>
    %26 = arith.mulf %25, %24 : vector<8x128xf32>
    %27 = arith.truncf %26 : vector<8x128xf32> to vector<8x128xbf16>
    %c0_16 = arith.constant 0 : index
    %c0_17 = arith.constant 0 : index
    %28 = vector.load %arg6[%c0_16, %c0_17] : memref<128x128xbf16, #tpu.memory_space<vmem>>, vector<128x128xbf16>
    %cst_18 = arith.constant dense<0.000000e+00> : vector<8x128xf32>
    %29 = tpu.matmul %27, %28, %cst_18 {dimension_numbers = #tpu.dot_dimension_numbers<[1], [0], [0], [1], [0, 0, 1, 1], [], []>} : vector<8x128xbf16>, vector<128x128xbf16>, vector<8x128xf32> -> vector<8x128xf32>
    %c0_19 = arith.constant 0 : index
    %c0_20 = arith.constant 0 : index
    %30 = vector.load %arg7[%c0_19, %c0_20] : memref<1x128xf32, #tpu.memory_space<vmem>>, vector<1x128xf32>
    %31 = vector.broadcast %30 : vector<1x128xf32> to vector<8x128xf32>
    %32 = arith.addf %29, %31 : vector<8x128xf32>
    %cst_21 = arith.constant 5.000000e-01 : f32
    %33 = vector.broadcast %cst_21 : f32 to vector<8x128xf32>
    %34 = arith.mulf %33, %32 : vector<8x128xf32>
    %35 = math.tanh %34 : vector<8x128xf32>
    %cst_22 = arith.constant 1.000000e+00 : f32
    %36 = vector.broadcast %cst_22 : f32 to vector<8x128xf32>
    %37 = arith.addf %35, %36 : vector<8x128xf32>
    %cst_23 = arith.constant 5.000000e-01 : f32
    %38 = vector.broadcast %cst_23 : f32 to vector<8x128xf32>
    %39 = arith.mulf %38, %37 : vector<8x128xf32>
    %40 = arith.truncf %39 : vector<8x128xf32> to vector<8x128xbf16>
    %c0_24 = arith.constant 0 : index
    %c0_25 = arith.constant 0 : index
    %41 = vector.load %arg8[%c0_24, %c0_25] : memref<128x4xbf16, #tpu.memory_space<vmem>>, vector<128x4xbf16>
    %cst_26 = arith.constant dense<0.000000e+00> : vector<8x4xf32>
    %42 = tpu.matmul %40, %41, %cst_26 {dimension_numbers = #tpu.dot_dimension_numbers<[1], [0], [0], [1], [0, 0, 1, 1], [], []>} : vector<8x128xbf16>, vector<128x4xbf16>, vector<8x4xf32> -> vector<8x4xf32>
    %c0_27 = arith.constant 0 : index
    %c0_28 = arith.constant 0 : index
    %43 = vector.load %arg9[%c0_27, %c0_28] : memref<1x4xf32, #tpu.memory_space<vmem>>, vector<1x4xf32>
    %44 = vector.broadcast %43 : vector<1x4xf32> to vector<8x4xf32>
    %45 = arith.addf %42, %44 : vector<8x4xf32>
    %c0_29 = arith.constant 0 : index
    %c0_30 = arith.constant 0 : index
    %46 = vector.load %arg10[%c0_29, %c0_30] : memref<8x4xf32, #tpu.memory_space<vmem>>, vector<8x4xf32>
    tpu.vector_store %arg10[%c0_29, %c0_30], %45 {strides = array<i32>} : memref<8x4xf32, #tpu.memory_space<vmem>>, vector<8x4xf32>,
    return
  }
  func.func @transform_0(%arg0: i32) -> (i32, i32) {
    %c0_i32 = arith.constant 0 : i32
    %c0_i32_0 = arith.constant 0 : i32
    return %arg0, %c0_i32 : i32, i32
  }
  func.func @transform_1(%arg0: i32) -> (i32, i32) {
    %c0_i32 = arith.constant 0 : i32
    %c0_i32_0 = arith.constant 0 : i32
    %c0_i32_1 = arith.constant 0 : i32
    return %c0_i32, %c0_i32_0 : i32, i32
  }
  func.func @transform_2(%arg0: i32) -> (i32, i32) {
    %c0_i32 = arith.constant 0 : i32
    %c0_i32_0 = arith.constant 0 : i32
    %c0_i32_1 = arith.constant 0 : i32
    return %c0_i32, %c0_i32_0 : i32, i32
  }
  func.func @transform_3(%arg0: i32) -> (i32, i32) {
    %c0_i32 = arith.constant 0 : i32
    %c0_i32_0 = arith.constant 0 : i32
    %c0_i32_1 = arith.constant 0 : i32
    return %c0_i32, %c0_i32_0 : i32, i32
  }
  func.func @transform_4(%arg0: i32) -> (i32, i32) {
    %c0_i32 = arith.constant 0 : i32
    %c0_i32_0 = arith.constant 0 : i32
    %c0_i32_1 = arith.constant 0 : i32
    return %c0_i32, %c0_i32_0 : i32, i32
  }
  func.func @transform_5(%arg0: i32) -> (i32, i32) {
    %c0_i32 = arith.constant 0 : i32
    %c0_i32_0 = arith.constant 0 : i32
    %c0_i32_1 = arith.constant 0 : i32
    return %c0_i32, %c0_i32_0 : i32, i32
  }
  func.func @transform_6(%arg0: i32) -> (i32, i32) {
    %c0_i32 = arith.constant 0 : i32
    %c0_i32_0 = arith.constant 0 : i32
    %c0_i32_1 = arith.constant 0 : i32
    return %c0_i32, %c0_i32_0 : i32, i32
  }
  func.func @transform_7(%arg0: i32) -> (i32, i32) {
    %c0_i32 = arith.constant 0 : i32
    %c0_i32_0 = arith.constant 0 : i32
    %c0_i32_1 = arith.constant 0 : i32
    return %c0_i32, %c0_i32_0 : i32, i32
  }
  func.func @transform_8(%arg0: i32) -> (i32, i32) {
    %c0_i32 = arith.constant 0 : i32
    %c0_i32_0 = arith.constant 0 : i32
    %c0_i32_1 = arith.constant 0 : i32
    return %c0_i32, %c0_i32_0 : i32, i32
  }
  func.func @transform_9(%arg0: i32) -> (i32, i32) {
    %c0_i32 = arith.constant 0 : i32
    %c0_i32_0 = arith.constant 0 : i32
    return %arg0, %c0_i32 : i32, i32
  }
}

</mosaic_0001>

<bundles_post_ra>
// kernel: tpu_custom_call.1
= control target key start
LH: loop header
LB: loop body
LE: loop exit
PB: predicated region body
PF: predicated region fallthrough
CT: control target
= control target key end

     0   :  { %14 = vsyncpa [#allocation3], 0  ;;  %s867_s0 = inlined_call_operand.vmem [shape: f32[8,16], index: 0, kind: input, shape index: {}]   ;;  %s868_s1 = inlined_call_operand.hbm [shape: bf16[16,128], index: 1, kind: input, shape index: {}]   ;;  %s869_s2 = inlined_call_operand.vmem [shape: f32[1,128], index: 2, kind: input, shape index: {}]   ;;  %s870_s3 = inlined_call_operand.vmem [shape: bf16[128,128], index: 3, kind: input, shape index: {}]   ;;  %s871_s4 = inlined_call_operand.vmem [shape: f32[1,128], index: 4, kind: input, shape index: {}]   ;;  %s872_s5 = inlined_call_operand.hbm [shape: bf16[128,128], index: 5, kind: input, shape index: {}]   ;;  %s873_s6 = inlined_call_operand.vmem [shape: f32[1,128], index: 6, kind: input, shape index: {}]   ;;  %s874_s7 = inlined_call_operand.vmem [shape: bf16[128,4], index: 7, kind: input, shape index: {}]   ;;  %s875_s8 = inlined_call_operand.vmem [shape: f32[1,4], index: 8, kind: input, shape index: {}]   ;;  %s876_s9 = inlined_call_operand.vmem [shape: f32[8,4], index: 9, kind: output, shape index: {}]  }
   0x1   :  { %15 = vsyncpa [#allocation5], 0  ;;  %s688_s30 = smov [#allocation2]   ;;  %s640_s13 = scalar_lea.hbm %s868_s1, 128 }
   0x2   :  { %s23_s10 = sshll.u32 %s688_s30, 4  ;;  %p641_p0 = scmp.ne.s32.totalorder %s868_s1, %s640_s13  ;;  %s24_s10 = int_to_ptr.vmem [resolvable:$true] %s23_s10 }
   0x3   :  { %p644_p1 = scmp.lt.u32.totalorder %s640_s13, %s868_s1 }
   0x5   :  { %p646_p2 = pnand %p644_p1, %p641_p0 }
   0x7   :  { %649 = shalt.err (!%p646_p2)
}
   0x8   :  { %s650_s18 = scalar_lea.vmem %s24_s10, 128  ;;  %p655_p4 = scmp.lt.s32.totalorder %s24_s10, %s24_s10 }
   0x9   :  { %p651_p3 = scmp.ne.s32.totalorder %s24_s10, %s650_s18  ;;  %p656_p5 = scmp.lt.s32.totalorder %s650_s18, %s650_s18 }
   0xb   :  { %p657_p6 = por %p656_p5, %p655_p4 }
   0xd   :  { %p658_p7 = pnand %p657_p6, %p651_p3 }
   0xf   :  { %661 = shalt.err (!%p658_p7)
}
  0x10   :  { %s689_s19 = smov 64   ;;  %s690_s20 = smov 4  }
  0x11   :  { %29 = dma.hbm_to_vmem [thread:$0]  %s868_s1, 128, %s24_s10, [#allocation3], %s689_s19, %s689_s19, %s690_s20  }
  0x12   :  { %s691_s23 = smov [#allocation4]   ;;  %s662_s27 = scalar_lea.hbm %s872_s5, 1024 }
  0x13   :  { %s41_s24 = sshll.u32 %s691_s23, 4  ;;  %p663_p8 = scmp.ne.s32.totalorder %s872_s5, %s662_s27  ;;  %s42_s24 = int_to_ptr.vmem [resolvable:$true] %s41_s24 }
  0x14   :  { %p666_p9 = scmp.lt.u32.totalorder %s662_s27, %s872_s5 }
  0x16   :  { %p668_p10 = pnand %p666_p9, %p663_p8 }
  0x18   :  { %671 = shalt.err (!%p668_p10)
}
  0x19   :  { %s672_s12 = scalar_lea.vmem %s42_s24, 1024  ;;  %p677_p12 = scmp.lt.s32.totalorder %s42_s24, %s42_s24 }
  0x1a   :  { %p673_p11 = scmp.ne.s32.totalorder %s42_s24, %s672_s12  ;;  %p678_p13 = scmp.lt.s32.totalorder %s672_s12, %s672_s12 }
  0x1c   :  { %p679_p0 = por %p678_p13, %p677_p12 }
  0x1e   :  { %p680_p1 = pnand %p679_p0, %p673_p11 }
  0x20   :  { %683 = shalt.err (!%p680_p1)
}
  0x21   :  { %47 = dma.hbm_to_vmem [thread:$0]  %s872_s5, 1024, %s42_s24, [#allocation5], %s689_s19, %s689_s19, %s690_s20  }
  0x22   :  { %684 = dma.done.wait [#allocation3], 128  }
  0x23   :  { %685 = vsyncadd [#allocation3], 4294967168 }
  0x24   :  { %686 = dma.done.wait [#allocation5], 1024  }
  0x25   :  { %687 = vsyncadd [#allocation5], 4294966272  ;;  %v692_v0 = vmov 0.0   ;;  %vm693_vm0 = vmmov 0   ;;  %v609_v1 = vld [vmem:[#allocation2] sm:$0xff]   ;;  %vm78_vm1 = vcmask 130048  }
  0x26   :  { %537 = vmatprep.subr.bf16.mxu0 %v692_v0  ;;  %539 = vmatprep.mubr.msk.bf16.mxu0 %vm693_vm0, %v692_v0  ;;  %v61_v2 = vld [vmem:[%s867_s0] sm:$0xff]  ;;  %v611_v5 = vld [vmem:[%s870_s3 + $0x8] sm:$0xff]   ;;  %v612_v6 = vld [vmem:[%s870_s3 + $0x10] sm:$0xff]   ;;  %vm470_vm2 = vcmask 31744  }
  0x27   :  { %543 = vmatprep.subr.bf16.mxu1 %v692_v0  ;;  %559 = vmatprep.mubr.msk.bf16.mxu1 %vm693_vm0, %v692_v0  ;;  %v62_v3 = vpack.c.bf16 %v61_v2, %v61_v2  ;;  %v610_v4 = vld [vmem:[%s870_s3] sm:$0xff]   ;;  %v613_v7 = vld [vmem:[%s870_s3 + $0x18] sm:$0xff]   ;;  %v615_v9 = vld [vmem:[%s870_s3 + $0x28] sm:$0xff]  }
  0x28   :  { %538 = vmatpush3.bf16.msra.mxu0 %v609_v1  ;;  %544 = vmatpush3.bf16.msra.mxu1 %v610_v4  ;;  %v614_v8 = vld [vmem:[%s870_s3 + $0x20] sm:$0xff]   ;;  %v616_v10 = vld [vmem:[%s870_s3 + $0x30] sm:$0xff]   ;;  %v617_v11 = vld [vmem:[%s870_s3 + $0x38] sm:$0xff]  }
  0x29   :  { %563 = vmatprep.subr.bf16.mxu0 %v692_v0  ;;  %545 = vmatprep.subr.bf16.mxu1 %v692_v0  ;;  %v618_v12 = vld [vmem:[#allocation4] sm:$0xff]   ;;  %v619_v13 = vld [vmem:[#allocation4 + $0x8] sm:$0xff]   ;;  %v620_v14 = vld [vmem:[#allocation4 + $0x10] sm:$0xff]  }
  0x2a   :  { %v478_v15 = vld [vmem:[%s869_s2] ss:$0 sm:$0xff]  ;;  %v622_v27 = vld [vmem:[#allocation4 + $0x20] sm:$0xff]   ;;  %v623_v28 = vld [vmem:[#allocation4 + $0x28] sm:$0xff]  }
  0x2b   :  { %540 = vmatmul.mubr.msk.bf16.vlgmr.msra.gmra.mrb[0].mxu0 %vm78_vm1, %v62_v3  ;;  %v621_v26 = vld [vmem:[#allocation4 + $0x18] sm:$0xff]   ;;  %v624_v29 = vld [vmem:[#allocation4 + $0x30] sm:$0xff]   ;;  %v627_v32 = vld [vmem:[%s874_s7 + $0x8] sm:$0xff]  }
  0x2c   :  { %579 = vmatprep.mubr.msk.bf16.mxu0 %vm693_vm0, %v692_v0  ;;  %546 = vmatpush3.bf16.msra.mxu1 %v611_v5  ;;  %v625_v30 = vld [vmem:[#allocation4 + $0x38] sm:$0xff]   ;;  %v628_v33 = vld [vmem:[%s874_s7 + $0x10] sm:$0xff]   ;;  %v629_v45 = vld [vmem:[%s874_s7 + $0x18] sm:$0xff]  }
  0x2d   :  { %547 = vmatprep.subr.bf16.mxu1 %v692_v0  ;;  %564 = vmatpush3.bf16.msra.mxu0 %v618_v12  ;;  %v626_v31 = vld [vmem:[%s874_s7] sm:$0xff]   ;;  %v631_v47 = vld [vmem:[%s874_s7 + $0x28] sm:$0xff]   ;;  %v632_v48 = vld [vmem:[%s874_s7 + $0x30] sm:$0xff]  }
  0x2e   :  { %565 = vmatprep.subr.bf16.mxu0 %v692_v0  ;;  %v481_v34 = vld [vmem:[%s871_s4] ss:$0 sm:$0xff]  ;;  %v633_v49 = vld [vmem:[%s874_s7 + $0x38] sm:$0xff]  }
  0x2f   :  { %v630_v46 = vld [vmem:[%s874_s7 + $0x20] sm:$0xff]  }
  0x30   :  { %548 = vmatpush3.bf16.msra.mxu1 %v612_v6  ;;  %v490_v50 = vld [vmem:[%s873_s6] ss:$0 sm:$0xff] }
  0x31   :  { %549 = vmatprep.subr.bf16.mxu1 %v692_v0  ;;  %566 = vmatpush3.bf16.msra.mxu0 %v619_v13  ;;  %v499_v61 = vld [vmem:[%s875_s8] ss:$0 sm:$0xff] }
  0x32   :  { %567 = vmatprep.subr.bf16.mxu0 %v692_v0 }
  0x34   :  { %550 = vmatpush3.bf16.msra.mxu1 %v613_v7 }
  0x35   :  { %551 = vmatprep.subr.bf16.mxu1 %v692_v0  ;;  %568 = vmatpush3.bf16.msra.mxu0 %v620_v14 }
  0x36   :  { %569 = vmatprep.subr.bf16.mxu0 %v692_v0 }
  0x38   :  { %552 = vmatpush3.bf16.msra.mxu1 %v614_v8 }
  0x39   :  { %553 = vmatprep.subr.bf16.mxu1 %v692_v0  ;;  %570 = vmatpush3.bf16.msra.mxu0 %v621_v26 }
  0x3a   :  { %571 = vmatprep.subr.bf16.mxu0 %v692_v0 }
  0x3c   :  { %554 = vmatpush3.bf16.msra.mxu1 %v615_v9 }
  0x3d   :  { %555 = vmatprep.subr.bf16.mxu1 %v692_v0  ;;  %572 = vmatpush3.bf16.msra.mxu0 %v622_v27 }
  0x3e   :  { %573 = vmatprep.subr.bf16.mxu0 %v692_v0 }
  0x40   :  { %556 = vmatpush3.bf16.msra.mxu1 %v616_v10 }
  0x41   :  { %557 = vmatprep.subr.bf16.mxu1 %v692_v0  ;;  %574 = vmatpush3.bf16.msra.mxu0 %v623_v28 }
  0x42   :  { %575 = vmatprep.subr.bf16.mxu0 %v692_v0 }
  0x44   :  { %558 = vmatpush3.bf16.msra.mxu1 %v617_v11 }
  0x45   :  { %583 = vmatprep.subr.bf16.mxu1 %v692_v0  ;;  %576 = vmatpush3.bf16.msra.mxu0 %v624_v29 }
  0x46   :  { %577 = vmatprep.subr.bf16.mxu0 %v692_v0 }
  0x49   :  { %578 = vmatpush3.bf16.msra.mxu0 %v625_v30 }
  0xfe   :  { %v116_v16 = vpop.f32.mrb[0].mxu0 }
  0xff   :  { %v117_v17 = vadd.f32 %v478_v15, %v116_v16  ;;  %v541_v18 = vpop.f32.mrb[1].mxu0 }
 0x100   :  { %v119_v19 = vpop.f32.mrb[2].mxu0 }
 0x101   :  { %v122_v20 = vmul.f32 0.5, %v117_v17  ;;  %v542_v21 = vpop.f32.mrb[3].mxu0 }
 0x103   :  { %634 = vtanh.f32 %v122_v20 }
 0x10d   :  { %v635_v22 = vpop.eup %634 }
 0x10e   :  { %v124_v23 = vadd.f32 1.0, %v635_v22 }
 0x110   :  { %v125_v24 = vmul.f32 0.5, %v124_v23 }
 0x112   :  { %v126_v25 = vpack.c.bf16 %v125_v24, %v125_v24 }
 0x114   :  { %560 = vmatmul.mubr.bf16.vlgmr.msra.gmra.mrb[0].mxu1 %v126_v25 }
 0x115   :  { %599 = vmatprep.mubr.msk.bf16.mxu1 %vm693_vm0, %v692_v0  ;;  %584 = vmatpush3.bf16.msra.mxu1 %v626_v31 }
 0x116   :  { %585 = vmatprep.subr.bf16.mxu1 %v692_v0 }
 0x119   :  { %586 = vmatpush3.bf16.msra.mxu1 %v627_v32 }
 0x11a   :  { %587 = vmatprep.subr.bf16.mxu1 %v692_v0 }
 0x11d   :  { %588 = vmatpush3.bf16.msra.mxu1 %v628_v33 }
 0x11e   :  { %589 = vmatprep.subr.bf16.mxu1 %v692_v0 }
 0x121   :  { %590 = vmatpush3.bf16.msra.mxu1 %v629_v45 }
 0x122   :  { %591 = vmatprep.subr.bf16.mxu1 %v692_v0 }
 0x125   :  { %592 = vmatpush3.bf16.msra.mxu1 %v630_v46 }
 0x126   :  { %593 = vmatprep.subr.bf16.mxu1 %v692_v0 }
 0x129   :  { %594 = vmatpush3.bf16.msra.mxu1 %v631_v47 }
 0x12a   :  { %595 = vmatprep.subr.bf16.mxu1 %v692_v0 }
 0x12d   :  { %596 = vmatpush3.bf16.msra.mxu1 %v632_v48 }
 0x12e   :  { %597 = vmatprep.subr.bf16.mxu1 %v692_v0 }
 0x131   :  { %598 = vmatpush3.bf16.msra.mxu1 %v633_v49 }
 0x1e7   :  { %v232_v35 = vpop.f32.mrb[0].mxu1 }
 0x1e8   :  { %v233_v36 = vadd.f32 %v481_v34, %v232_v35  ;;  %v561_v37 = vpop.f32.mrb[1].mxu1 }
 0x1e9   :  { %v235_v38 = vpop.f32.mrb[2].mxu1 }
 0x1ea   :  { %v238_v39 = vmul.f32 0.5, %v233_v36  ;;  %v562_v40 = vpop.f32.mrb[3].mxu1 }
 0x1ec   :  { %636 = vtanh.f32 %v238_v39 }
 0x1f6   :  { %v637_v41 = vpop.eup %636 }
 0x1f7   :  { %v240_v42 = vadd.f32 1.0, %v637_v41 }
 0x1f9   :  { %v241_v43 = vmul.f32 0.5, %v240_v42 }
 0x1fb   :  { %v242_v44 = vpack.c.bf16 %v241_v43, %v241_v43 }
 0x1fd   :  { %580 = vmatmul.mubr.bf16.vlgmr.msra.gmra.mrb[4].mxu0 %v242_v44 }
 0x2d0   :  { %v348_v51 = vpop.f32.mrb[4].mxu0 }
 0x2d1   :  { %v349_v52 = vadd.f32 %v490_v50, %v348_v51  ;;  %v581_v53 = vpop.f32.mrb[5].mxu0 }
 0x2d2   :  { %v351_v54 = vpop.f32.mrb[6].mxu0 }
 0x2d3   :  { %v354_v55 = vmul.f32 0.5, %v349_v52  ;;  %v582_v56 = vpop.f32.mrb[7].mxu0 }
 0x2d5   :  { %638 = vtanh.f32 %v354_v55 }
 0x2df   :  { %v639_v57 = vpop.eup %638 }
 0x2e0   :  { %v356_v58 = vadd.f32 1.0, %v639_v57 }
 0x2e2   :  { %v357_v59 = vmul.f32 0.5, %v356_v58 }
 0x2e4   :  { %v358_v60 = vpack.c.bf16 %v357_v59, %v357_v59 }
 0x2e6   :  { %600 = vmatmul.mubr.bf16.vlgmr.msra.gmra.mrb[4].mxu1 %v358_v60 }
 0x3b9   :  { %v464_v62 = vpop.f32.mrb[4].mxu1 }
 0x3ba   :  { %v465_v63 = vadd.f32 %v499_v61, %v464_v62  ;;  %v601_v0 = vpop.f32.mrb[5].mxu1 }
 0x3bb   :  { %v467_v1 = vpop.f32.mrb[6].mxu1 }
 0x3bc   :  { %471 = vst.msk [vmem:[%s876_s9] sm:$0xff] %vm470_vm2, %v465_v63  ;;  %v602_v2 = vpop.f32.mrb[7].mxu1 }
 0x3bd   :  { %476 = vsyncpa [#allocation3], 1 }
 0x3be   :  { %477 = vsyncpa [#allocation5], 1 }

</bundles_post_ra>
